<compile_context>
chip_gen: v7x
topology: tpu7x:2x2x1
jax: 0.10.0
libtpu: 0.0.40
codegen_flags: <defaults>
</compile_context>

<pallas_src>
import jax
import jax.numpy as jnp
from jax.experimental import pallas as pl
from jax.experimental.pallas import tpu as pltpu


def _round_up(x, m):
    return ((x + m - 1) // m) * m


def mlp_d_kernel(x_ref, w1_ref, b1_ref, w2_ref, b2_ref, w3_ref, b3_ref, o_ref):
    # x_ref: (tb, G) tile of the batch; weights fully resident in VMEM.
    mm_dtype = w1_ref.dtype                      # f32 or bf16 (MXU input dtype)
    x = x_ref[...].astype(mm_dtype)

    # l1 (MXU) + bias + LeakyReLU(0.2) -- VPU math kept in f32.
    h = jnp.dot(x, w1_ref[...], preferred_element_type=jnp.float32) + b1_ref[...]
    h = jnp.maximum(h, 0.2 * h)

    # l2 (MXU) + bias + LeakyReLU(0.2)
    h = jnp.dot(h.astype(mm_dtype), w2_ref[...],
                preferred_element_type=jnp.float32) + b2_ref[...]
    h = jnp.maximum(h, 0.2 * h)

    # l3: (tb,128)·(1,128) row -> VPU multiply + lane reduce (no N=1 MXU matmul).
    # keepdims=True leaves the result as a (tb, 1) column -> no sublane->lane
    # relayout before the store. b3 is a scalar read from SMEM.
    logits = jnp.sum(h * w3_ref[...], axis=-1, keepdims=True) + b3_ref[0]   # (tb,1)

    o_ref[...] = jax.nn.sigmoid(logits).astype(o_ref.dtype)


def mlp_d_forward(x, params, *, tb=None, use_bf16=True):
    """x: (B, G) float. Returns (B,) float32, matching `output.view(-1)`."""
    w1, b1, w2, b2, w3, b3 = params
    B, G = x.shape
    H = w1.shape[1]                              # 128

    # --- batch tile selection -----------------------------------------------
    if tb is None:
        if B <= 4096:
            tb = _round_up(B, 256)               # single grid step
        else:
            # 2048-4096 rows/tile, multiple of 256, even tile count so the
            # "parallel" grid axis balances across the 2 v7x TensorCores.
            n = pl.cdiv(B, 4096)
            n += n % 2
            tb = _round_up(pl.cdiv(B, n), 256)
    # Never use a tile larger than the (8-rounded) batch; keep 8-divisibility.
    tb = max(8, min(_round_up(int(tb), 8), _round_up(B, 8)))
    num_tiles = pl.cdiv(B, tb)

    # --- dtypes for the MXU matmuls ------------------------------------------
    # Only the (tiny) weights are cast in the wrapper; the x tile is cast to
    # the matmul dtype inside the kernel, so no extra HBM pass over x.
    if use_bf16:
        w1 = w1.astype(jnp.bfloat16)
        w2 = w2.astype(jnp.bfloat16)
    # b1/b2/w3/b3 stay f32 (bias add, LeakyReLU and the l3 reduce run on the VPU).

    def _nbytes(a):
        return int(a.size) * a.dtype.itemsize

    cost = pl.CostEstimate(
        flops=2 * B * (G * H + H * H + H),
        transcendentals=B,                        # one sigmoid per row
        bytes_accessed=(_nbytes(x) + _nbytes(w1) + _nbytes(b1) + _nbytes(w2)
                        + _nbytes(b2) + _nbytes(w3) + _nbytes(b3) + B * 4),
    )

    out = pl.pallas_call(
        mlp_d_kernel,
        out_shape=jax.ShapeDtypeStruct((B, 1), jnp.float32),
        grid_spec=pltpu.PrefetchScalarGridSpec(
            num_scalar_prefetch=0,
            grid=(num_tiles,),
            in_specs=[
                pl.BlockSpec((tb, G), lambda i: (i, 0)),      # x tile
                pl.BlockSpec((G, H), lambda i: (0, 0)),       # W1
                pl.BlockSpec((1, H), lambda i: (0, 0)),       # b1
                pl.BlockSpec((H, H), lambda i: (0, 0)),       # W2
                pl.BlockSpec((1, H), lambda i: (0, 0)),       # b2
                pl.BlockSpec((1, H), lambda i: (0, 0)),       # W3 row (PyTorch layout)
                pl.BlockSpec(memory_space=pltpu.MemorySpace.SMEM),  # b3 scalar
            ],
            out_specs=pl.BlockSpec((tb, 1), lambda i: (i, 0)),
        ),
        compiler_params=pltpu.CompilerParams(
            dimension_semantics=("parallel",)),
        cost_estimate=cost,
    )(x, w1, b1, w2, b2, w3, b3)

    return out.reshape(-1)


def init_params(key, gaussian_size, hidden=128):
    """Deterministic init mimicking PyTorch nn.Linear (uniform +/- 1/sqrt(fan_in)).

    W1/W2 are stored transposed vs. PyTorch, i.e. (in_features, out_features);
    W3 is stored as the PyTorch (1, in_features) row; b3 is a (1,) scalar."""
    ks = jax.random.split(key, 6)

    def lin(kw, kb, fan_in, fan_out):
        bound = 1.0 / jnp.sqrt(fan_in)
        w = jax.random.uniform(kw, (fan_in, fan_out), jnp.float32, -bound, bound)
        b = jax.random.uniform(kb, (1, fan_out), jnp.float32, -bound, bound)
        return w, b

    w1, b1 = lin(ks[0], ks[1], gaussian_size, hidden)
    w2, b2 = lin(ks[2], ks[3], hidden, hidden)
    w3t, b3t = lin(ks[4], ks[5], hidden, 1)
    w3 = w3t.T                      # (1, hidden) row
    b3 = b3t.reshape(-1)            # (1,)
    return (w1, b1, w2, b2, w3, b3)


def mlp_d_ref(x, params):
    """Pure-JAX f32 reference for correctness checking."""
    w1, b1, w2, b2, w3, b3 = params
    h = x @ w1 + b1
    h = jnp.where(h > 0, h, 0.2 * h)
    h = h @ w2 + b2
    h = jnp.where(h > 0, h, 0.2 * h)
    h = h @ w3.T + b3
    return jax.nn.sigmoid(h).reshape(-1)


if __name__ == "__main__":
    key = jax.random.PRNGKey(0)
    k_param, k_x = jax.random.split(key)

    gaussian_size = 32
    batch = 8

    params = init_params(k_param, gaussian_size)
    x = jax.random.normal(k_x, (batch, gaussian_size), jnp.float32)
    ref = mlp_d_ref(x, params)

    # Exact-PyTorch f32 path, single grid step.
    out_f32 = jax.block_until_ready(mlp_d_forward(x, params, use_bf16=False))
    assert out_f32.shape == (batch,)
    assert jnp.allclose(out_f32, ref, atol=1e-5, rtol=1e-5), (out_f32, ref)

    # Default (bf16 MXU) path; f32 accumulation, looser tolerance.
    out_bf16 = jax.block_until_ready(mlp_d_forward(x, params))
    assert jnp.allclose(out_bf16, ref, atol=2e-2, rtol=2e-2), (out_bf16, ref)

    # Larger, non-divisible batch: multi-step grid + ragged final block
    # (no wrapper-side padding; Pallas clamps the last tile).
    x2 = jax.random.normal(jax.random.PRNGKey(1), (200, gaussian_size), jnp.float32)
    ref2 = mlp_d_ref(x2, params)

    out2_f32 = jax.block_until_ready(mlp_d_forward(x2, params, tb=128, use_bf16=False))
    assert out2_f32.shape == (200,)
    assert jnp.allclose(out2_f32, ref2, atol=1e-5, rtol=1e-5)

    out2_bf16 = jax.block_until_ready(mlp_d_forward(x2, params, tb=128))
    assert jnp.allclose(out2_bf16, ref2, atol=2e-2, rtol=2e-2)

    # Default tile selection on the larger batch (single 256-row-capped tile).
    out2_def = jax.block_until_ready(mlp_d_forward(x2, params))
    assert jnp.allclose(out2_def, ref2, atol=2e-2, rtol=2e-2)

    print("KERNEL_OK")
</pallas_src>

<mosaic_0001>
module attributes {stable_mosaic.version = 11 : i64} {
  func.func @mlp_d_kernel(%arg0: i32, %arg1: memref<8x32xf32, #tpu.memory_space<vmem>>, %arg2: memref<32x128xf32, #tpu.memory_space<vmem>>, %arg3: memref<1x128xf32, #tpu.memory_space<vmem>>, %arg4: memref<128x128xf32, #tpu.memory_space<vmem>>, %arg5: memref<1x128xf32, #tpu.memory_space<vmem>>, %arg6: memref<1x128xf32, #tpu.memory_space<vmem>>, %arg7: memref<1xf32, #tpu.memory_space<smem>>, %arg8: memref<8x1xf32, #tpu.memory_space<vmem>>) attributes {dimension_semantics = [#tpu.dimension_semantics<parallel>], iteration_bounds = array<i64: 1>, scalar_prefetch = 0 : i64, scratch_operands = 0 : i64, tpu.core_type = #tpu.core_type<tc>, window_params = [{transform_indices = @transform_0, window_bounds = array<i64: 8, 32>}, {pipeline_mode = #tpu.pipeline_mode<synchronous>, transform_indices = @transform_1, window_bounds = array<i64: 32, 128>}, {pipeline_mode = #tpu.pipeline_mode<synchronous>, transform_indices = @transform_2, window_bounds = array<i64: 1, 128>}, {pipeline_mode = #tpu.pipeline_mode<synchronous>, transform_indices = @transform_3, window_bounds = array<i64: 128, 128>}, {pipeline_mode = #tpu.pipeline_mode<synchronous>, transform_indices = @transform_4, window_bounds = array<i64: 1, 128>}, {pipeline_mode = #tpu.pipeline_mode<synchronous>, transform_indices = @transform_5, window_bounds = array<i64: 1, 128>}, {transform_indices = @transform_6, window_bounds = array<i64: 1>}, {transform_indices = @transform_7, window_bounds = array<i64: 8, 1>}]} {
    %c0 = arith.constant 0 : index
    %c0_0 = arith.constant 0 : index
    %0 = vector.load %arg1[%c0, %c0_0] : memref<8x32xf32, #tpu.memory_space<vmem>>, vector<8x32xf32>
    %c0_1 = arith.constant 0 : index
    %c0_2 = arith.constant 0 : index
    %1 = vector.load %arg2[%c0_1, %c0_2] : memref<32x128xf32, #tpu.memory_space<vmem>>, vector<32x128xf32>
    %cst = arith.constant dense<0.000000e+00> : vector<8x128xf32>
    %2 = tpu.matmul %0, %1, %cst {dimension_numbers = #tpu.dot_dimension_numbers<[1], [0], [0], [1], [0, 0, 1, 1], [], []>} : vector<8x32xf32>, vector<32x128xf32>, vector<8x128xf32> -> vector<8x128xf32>
    %c0_3 = arith.constant 0 : index
    %c0_4 = arith.constant 0 : index
    %3 = vector.load %arg3[%c0_3, %c0_4] : memref<1x128xf32, #tpu.memory_space<vmem>>, vector<1x128xf32>
    %4 = vector.broadcast %3 : vector<1x128xf32> to vector<8x128xf32>
    %5 = arith.addf %2, %4 : vector<8x128xf32>
    %cst_5 = arith.constant 2.000000e-01 : f32
    %6 = vector.broadcast %cst_5 : f32 to vector<8x128xf32>
    %7 = arith.mulf %6, %5 : vector<8x128xf32>
    %8 = arith.maximumf %5, %7 : vector<8x128xf32>
    %c0_6 = arith.constant 0 : index
    %c0_7 = arith.constant 0 : index
    %9 = vector.load %arg4[%c0_6, %c0_7] : memref<128x128xf32, #tpu.memory_space<vmem>>, vector<128x128xf32>
    %cst_8 = arith.constant dense<0.000000e+00> : vector<8x128xf32>
    %10 = tpu.matmul %8, %9, %cst_8 {dimension_numbers = #tpu.dot_dimension_numbers<[1], [0], [0], [1], [0, 0, 1, 1], [], []>} : vector<8x128xf32>, vector<128x128xf32>, vector<8x128xf32> -> vector<8x128xf32>
    %c0_9 = arith.constant 0 : index
    %c0_10 = arith.constant 0 : index
    %11 = vector.load %arg5[%c0_9, %c0_10] : memref<1x128xf32, #tpu.memory_space<vmem>>, vector<1x128xf32>
    %12 = vector.broadcast %11 : vector<1x128xf32> to vector<8x128xf32>
    %13 = arith.addf %10, %12 : vector<8x128xf32>
    %cst_11 = arith.constant 2.000000e-01 : f32
    %14 = vector.broadcast %cst_11 : f32 to vector<8x128xf32>
    %15 = arith.mulf %14, %13 : vector<8x128xf32>
    %16 = arith.maximumf %13, %15 : vector<8x128xf32>
    %c0_12 = arith.constant 0 : index
    %c0_13 = arith.constant 0 : index
    %17 = vector.load %arg6[%c0_12, %c0_13] : memref<1x128xf32, #tpu.memory_space<vmem>>, vector<1x128xf32>
    %18 = vector.broadcast %17 : vector<1x128xf32> to vector<8x128xf32>
    %19 = arith.mulf %16, %18 : vector<8x128xf32>
    %cst_14 = arith.constant dense<0.000000e+00> : vector<8xf32>
    %20 = vector.multi_reduction <add>, %19, %cst_14 [1] : vector<8x128xf32> to vector<8xf32>
    %21 = vector.shape_cast %20 : vector<8xf32> to vector<8x1xf32>
    %c0_15 = arith.constant 0 : index
    %22 = memref.load %arg7[%c0_15] : memref<1xf32, #tpu.memory_space<smem>>
    %23 = vector.broadcast %22 : f32 to vector<8x1xf32>
    %24 = arith.addf %21, %23 : vector<8x1xf32>
    %25 = arith.negf %24 : vector<8x1xf32>
    %26 = math.exp %25 : vector<8x1xf32>
    %cst_16 = arith.constant 1.000000e+00 : f32
    %27 = vector.broadcast %cst_16 : f32 to vector<8x1xf32>
    %28 = arith.addf %27, %26 : vector<8x1xf32>
    %29 = arith.divf %27, %28 : vector<8x1xf32>
    %c0_17 = arith.constant 0 : index
    %c0_18 = arith.constant 0 : index
    %30 = vector.load %arg8[%c0_17, %c0_18] : memref<8x1xf32, #tpu.memory_space<vmem>>, vector<8x1xf32>
    tpu.vector_store %arg8[%c0_17, %c0_18], %29 {strides = array<i32>} : memref<8x1xf32, #tpu.memory_space<vmem>>, vector<8x1xf32>,
    return
  }
  func.func @transform_0(%arg0: i32) -> (i32, i32) {
    %c0_i32 = arith.constant 0 : i32
    %c0_i32_0 = arith.constant 0 : i32
    return %arg0, %c0_i32 : i32, i32
  }
  func.func @transform_1(%arg0: i32) -> (i32, i32) {
    %c0_i32 = arith.constant 0 : i32
    %c0_i32_0 = arith.constant 0 : i32
    %c0_i32_1 = arith.constant 0 : i32
    return %c0_i32, %c0_i32_0 : i32, i32
  }
  func.func @transform_2(%arg0: i32) -> (i32, i32) {
    %c0_i32 = arith.constant 0 : i32
    %c0_i32_0 = arith.constant 0 : i32
    %c0_i32_1 = arith.constant 0 : i32
    return %c0_i32, %c0_i32_0 : i32, i32
  }
  func.func @transform_3(%arg0: i32) -> (i32, i32) {
    %c0_i32 = arith.constant 0 : i32
    %c0_i32_0 = arith.constant 0 : i32
    %c0_i32_1 = arith.constant 0 : i32
    return %c0_i32, %c0_i32_0 : i32, i32
  }
  func.func @transform_4(%arg0: i32) -> (i32, i32) {
    %c0_i32 = arith.constant 0 : i32
    %c0_i32_0 = arith.constant 0 : i32
    %c0_i32_1 = arith.constant 0 : i32
    return %c0_i32, %c0_i32_0 : i32, i32
  }
  func.func @transform_5(%arg0: i32) -> (i32, i32) {
    %c0_i32 = arith.constant 0 : i32
    %c0_i32_0 = arith.constant 0 : i32
    %c0_i32_1 = arith.constant 0 : i32
    return %c0_i32, %c0_i32_0 : i32, i32
  }
  func.func @transform_6(%arg0: i32) -> i32 {
    %c0_i32 = arith.constant 0 : i32
    %c0_i32_0 = arith.constant 0 : i32
    return %c0_i32 : i32
  }
  func.func @transform_7(%arg0: i32) -> (i32, i32) {
    %c0_i32 = arith.constant 0 : i32
    %c0_i32_0 = arith.constant 0 : i32
    return %arg0, %c0_i32 : i32, i32
  }
}

</mosaic_0001>

<bundles_post_ra>
// kernel: tpu_custom_call.1
= control target key start
LH: loop header
LB: loop body
LE: loop exit
PB: predicated region body
PF: predicated region fallthrough
CT: control target
= control target key end

     0   :  { %13 = vsyncpa [#allocation4], 0  ;;  %s566_s0 = inlined_call_operand.hbm [shape: f32[8,32], index: 0, kind: input, shape index: {}]   ;;  %s567_s1 = inlined_call_operand.hbm [shape: f32[32,128], index: 1, kind: input, shape index: {}]   ;;  %s568_s2 = inlined_call_operand.vmem [shape: f32[1,128], index: 2, kind: input, shape index: {}]   ;;  %s569_s3 = inlined_call_operand.hbm [shape: f32[128,128], index: 3, kind: input, shape index: {}]   ;;  %s570_s4 = inlined_call_operand.vmem [shape: f32[1,128], index: 4, kind: input, shape index: {}]   ;;  %s571_s5 = inlined_call_operand.vmem [shape: f32[1,128], index: 5, kind: input, shape index: {}]   ;;  %s572_s6 = inlined_call_operand.<no memory space> [shape: f32[1], index: 6, kind: input, shape index: {}]   ;;  %s573_s7 = inlined_call_operand.vmem [shape: f32[8,1], index: 7, kind: output, shape index: {}]  }
   0x1   :  { %14 = vsyncpa [#allocation6], 0  ;;  %s461_s24 = smov [#allocation5]   ;;  %s391_s28 = scalar_lea.hbm %s567_s1, 512 }
   0x2   :  { %s30_s25 = sshll.u32 %s461_s24, 4  ;;  %p392_p0 = scmp.ne.s32.totalorder %s567_s1, %s391_s28  ;;  %s31_s25 = int_to_ptr.vmem [resolvable:$true] %s30_s25 }
   0x3   :  { %p395_p1 = scmp.lt.u32.totalorder %s391_s28, %s567_s1 }
   0x5   :  { %p397_p2 = pnand %p395_p1, %p392_p0 }
   0x7   :  { %400 = shalt.err (!%p397_p2)
}
   0x8   :  { %s401_s10 = scalar_lea.vmem %s31_s25, 512  ;;  %p406_p4 = scmp.lt.s32.totalorder %s31_s25, %s31_s25 }
   0x9   :  { %p402_p3 = scmp.ne.s32.totalorder %s31_s25, %s401_s10  ;;  %p407_p5 = scmp.lt.s32.totalorder %s401_s10, %s401_s10 }
   0xb   :  { %p408_p6 = por %p407_p5, %p406_p4 }
   0xd   :  { %p409_p7 = pnand %p408_p6, %p402_p3 }
   0xf   :  { %412 = shalt.err (!%p409_p7)
}
  0x10   :  { %s462_s11 = smov 128   ;;  %s463_s12 = smov 8  }
  0x11   :  { %36 = dma.hbm_to_vmem [thread:$0]  %s567_s1, 512, %s31_s25, [#allocation6], %s462_s11, %s462_s11, %s463_s12  }
  0x12   :  { %s464_s15 = smov [#allocation3]   ;;  %s465_s17 = smov [#allocation7]  }
  0x13   :  { %s21_s16 = sshll.u32 %s464_s15, 4  ;;  %s44_s18 = sshll.u32 %s465_s17, 4  ;;  %s22_s16 = int_to_ptr.vmem [resolvable:$true] %s21_s16  ;;  %s45_s18 = int_to_ptr.vmem [resolvable:$true] %s44_s18 }
  0x14   :  { %s413_s21 = scalar_lea.hbm %s566_s0, 128 }
  0x15   :  { %p414_p8 = scmp.ne.s32.totalorder %s566_s0, %s413_s21  ;;  %p417_p9 = scmp.lt.u32.totalorder %s413_s21, %s566_s0 }
  0x17   :  { %p419_p10 = pnand %p417_p9, %p414_p8 }
  0x19   :  { %422 = shalt.err (!%p419_p10)
}
  0x1a   :  { %s423_s1 = scalar_lea.vmem %s22_s16, 128  ;;  %p428_p12 = scmp.lt.s32.totalorder %s22_s16, %s22_s16 }
  0x1b   :  { %p424_p11 = scmp.ne.s32.totalorder %s22_s16, %s423_s1  ;;  %p429_p13 = scmp.lt.s32.totalorder %s423_s1, %s423_s1 }
  0x1d   :  { %p430_p0 = por %p429_p13, %p428_p12 }
  0x1f   :  { %p431_p1 = pnand %p430_p0, %p424_p11 }
  0x21   :  { %434 = shalt.err (!%p431_p1)
}
  0x22   :  { %24 = dma.hbm_to_vmem [thread:$0]  %s566_s0, 128, %s22_s16, [#allocation4]  }
  0x23   :  { %s435_s30 = scalar_lea.hbm %s569_s3, 2048 }
  0x24   :  { %p436_p2 = scmp.ne.s32.totalorder %s569_s3, %s435_s30  ;;  %p439_p3 = scmp.lt.u32.totalorder %s435_s30, %s569_s3 }
  0x26   :  { %p441_p4 = pnand %p439_p3, %p436_p2 }
  0x28   :  { %444 = shalt.err (!%p441_p4)
}
  0x29   :  { %s445_s14 = scalar_lea.vmem %s45_s18, 2048  ;;  %p450_p6 = scmp.lt.s32.totalorder %s45_s18, %s45_s18 }
  0x2a   :  { %p446_p5 = scmp.ne.s32.totalorder %s45_s18, %s445_s14  ;;  %p451_p7 = scmp.lt.s32.totalorder %s445_s14, %s445_s14 }
  0x2c   :  { %p452_p8 = por %p451_p7, %p450_p6 }
  0x2e   :  { %p453_p9 = pnand %p452_p8, %p446_p5 }
  0x30   :  { %456 = shalt.err (!%p453_p9)
}
  0x31   :  { %50 = dma.hbm_to_vmem [thread:$0]  %s569_s3, 2048, %s45_s18, [#allocation6], %s462_s11, %s462_s11, %s463_s12  }
  0x32   :  { %457 = dma.done.wait [#allocation4], 128  }
  0x33   :  { %458 = vsyncadd [#allocation4], 4294967168 }
  0x34   :  { %459 = dma.done.wait [#allocation6], 2560  }
  0x35   :  { %460 = vsyncadd [#allocation6], 4294964736  ;;  %v466_v0 = vmov 0.0|0.0   ;;  %vm467_vm0 = vmmov 0   ;;  %v468_v1 = vmov 0.0   ;;  %v67_v2 = vld [vmem:[#allocation5] sm:$0xff]  ;;  %v260_v47 = vstv %s572_s6 }
  0x36   :  { %349 = vmatprep.subr.bf16.mxu0 %v466_v0  ;;  %311 = vmatprep.mubr.msk.f32.mxu0 %vm467_vm0, %v468_v1  ;;  %v68_v3 = vld [vmem:[#allocation5 + $0x8] sm:$0xff]  ;;  %v69_v4 = vld [vmem:[#allocation5 + $0x10] sm:$0xff]  ;;  %v70_v6 = vld [vmem:[#allocation5 + $0x18] sm:$0xff]  ;;  %vm78_vm1 = vcmask 261120   ;;  %vm268_vm2 = vcmask 7168  }
  0x37   :  { %355 = vmatprep.subr.bf16.mxu1 %v466_v0  ;;  %346 = vmatprep.mubr.msk.f32.mxu1 %vm467_vm0, %v468_v1  ;;  %v350_v5 = vpack.c.bf16 %v68_v3, %v67_v2  ;;  %v154_v7 = vld [vmem:[#allocation7] sm:$0xff]  ;;  %v155_v8 = vld [vmem:[#allocation7 + $0x8] sm:$0xff]  ;;  %v156_v9 = vld [vmem:[#allocation7 + $0x10] sm:$0xff]  ;;  %v353_v11 = vpack.c.bf16 %v70_v6, %v69_v4 }
  0x38   :  { %v157_v10 = vld [vmem:[#allocation7 + $0x18] sm:$0xff]  ;;  %v356_v12 = vpack.c.bf16 %v155_v8, %v154_v7  ;;  %v158_v14 = vld [vmem:[#allocation7 + $0x20] sm:$0xff]  ;;  %v159_v15 = vld [vmem:[#allocation7 + $0x28] sm:$0xff] }
  0x39   :  { %351 = vmatpush3.bf16.msra.mxu0 %v350_v5  ;;  %v359_v13 = vpack.c.bf16 %v157_v10, %v156_v9  ;;  %v66_v16 = vld [vmem:[#allocation3] sm:$0xff]  ;;  %v362_v17 = vpack.c.bf16 %v159_v15, %v158_v14  ;;  %v160_v18 = vld [vmem:[#allocation7 + $0x30] sm:$0xff]  ;;  %v162_v21 = vld [vmem:[#allocation7 + $0x40] sm:$0xff] }
  0x3a   :  { %352 = vmatprep.subr.bf16.mxu0 %v466_v0  ;;  %357 = vmatpush3.bf16.msra.mxu1 %v356_v12  ;;  %v161_v19 = vld [vmem:[#allocation7 + $0x38] sm:$0xff]  ;;  %v163_v22 = vld [vmem:[#allocation7 + $0x48] sm:$0xff]  ;;  %v164_v24 = vld [vmem:[#allocation7 + $0x50] sm:$0xff] }
  0x3b   :  { %358 = vmatprep.subr.bf16.mxu1 %v466_v0  ;;  %v365_v20 = vpack.c.bf16 %v161_v19, %v160_v18  ;;  %v368_v23 = vpack.c.bf16 %v163_v22, %v162_v21  ;;  %v165_v25 = vld [vmem:[#allocation7 + $0x58] sm:$0xff]  ;;  %v166_v27 = vld [vmem:[#allocation7 + $0x60] sm:$0xff]  ;;  %v167_v28 = vld [vmem:[#allocation7 + $0x68] sm:$0xff] }
  0x3c   :  { %v371_v26 = vpack.c.bf16 %v165_v25, %v164_v24  ;;  %v374_v29 = vpack.c.bf16 %v167_v28, %v166_v27  ;;  %v168_v30 = vld [vmem:[#allocation7 + $0x70] sm:$0xff]  ;;  %v169_v31 = vld [vmem:[#allocation7 + $0x78] sm:$0xff] }
  0x3d   :  { %354 = vmatpush3.bf16.msra.mxu0 %v353_v11  ;;  %v377_v32 = vpack.c.bf16 %v169_v31, %v168_v30  ;;  %v276_v33 = vld [vmem:[%s568_s2] ss:$0 sm:$0xff] }
  0x3e   :  { %360 = vmatpush3.bf16.msra.mxu1 %v359_v13  ;;  %v278_v39 = vld [vmem:[%s570_s4] ss:$0 sm:$0xff] }
  0x3f   :  { %361 = vmatprep.subr.bf16.mxu1 %v466_v0  ;;  %v279_v44 = vld [vmem:[%s571_s5] ss:$0 sm:$0xff] }
  0x40   :  { %312 = vmatmul.mubr.msk.f32.vlgmr.msra.gmra.mrb[0].mxu0 %vm78_vm1, %v66_v16 }
  0x42   :  { %363 = vmatpush3.bf16.msra.mxu1 %v362_v17 }
  0x43   :  { %364 = vmatprep.subr.bf16.mxu1 %v466_v0 }
  0x46   :  { %366 = vmatpush3.bf16.msra.mxu1 %v365_v20 }
  0x47   :  { %367 = vmatprep.subr.bf16.mxu1 %v466_v0 }
  0x4a   :  { %369 = vmatpush3.bf16.msra.mxu1 %v368_v23 }
  0x4b   :  { %370 = vmatprep.subr.bf16.mxu1 %v466_v0 }
  0x4e   :  { %372 = vmatpush3.bf16.msra.mxu1 %v371_v26 }
  0x4f   :  { %373 = vmatprep.subr.bf16.mxu1 %v466_v0 }
  0x52   :  { %375 = vmatpush3.bf16.msra.mxu1 %v374_v29 }
  0x53   :  { %376 = vmatprep.subr.bf16.mxu1 %v466_v0 }
  0x56   :  { %378 = vmatpush3.bf16.msra.mxu1 %v377_v32 }
 0x113   :  { %v148_v34 = vpop.f32.mrb[0].mxu0 }
 0x114   :  { %v149_v35 = vadd.f32 %v276_v33, %v148_v34  ;;  %v313_v36 = vpop.f32.mrb[1].mxu0 }
 0x116   :  { %v152_v37 = vmul.f32 0.2, %v149_v35 }
 0x118   :  { %v153_v38 = vmax.f32 %v149_v35, %v152_v37 }
 0x11a   :  { %347 = vmatmul.mubr.f32.vlgmr.msra.gmra.mrb[0].mxu1 %v153_v38 }
 0x1ed   :  { %v243_v40 = vpop.f32.mrb[0].mxu1 }
 0x1ee   :  { %v244_v41 = vadd.f32 %v278_v39, %v243_v40  ;;  %v348_v42 = vpop.f32.mrb[1].mxu1 }
 0x1f0   :  { %v247_v43 = vmul.f32 0.2, %v244_v41 }
 0x1f2   :  { %v248_v45 = vmax.f32 %v244_v41, %v247_v43 }
 0x1f4   :  { %v256_v46 = vmul.f32 %v279_v44, %v248_v45 }
 0x1f6   :  { %257 = vadd.xlane.f32.xlu0 %v256_v46 }
 0x283   :  { %v258_v48 = vpop.xlane.xlu0 %257 }
 0x284   :  { %v261_v49 = vadd.f32 %v260_v47, %v258_v48 }
 0x286   :  { %v280_v50 = vmul.f32 -1.442695, %v261_v49 }
 0x288   :  { %387 = vpow2.f32 %v280_v50 }
 0x292   :  { %v388_v51 = vpop.eup %387 }
 0x293   :  { %v265_v52 = vadd.f32 1.0, %v388_v51 }
 0x295   :  { %389 = vrcp.f32 %v265_v52 }
 0x29f   :  { %v390_v53 = vpop.eup %389 }
 0x2a0   :  { %269 = vst.msk [vmem:[%s573_s7] sm:$0xff] %vm268_vm2, %v390_v53 }
 0x2a1   :  { %274 = vsyncpa [#allocation4], 1 }
 0x2a2   :  { %275 = vsyncpa [#allocation6], 1 }

</bundles_post_ra>
